<compile_context>
chip_gen: v7x
topology: tpu7x:2x2x1
jax: 0.10.0
libtpu: 0.0.40
codegen_flags: <defaults>
</compile_context>

<pallas_src>
import functools

import numpy as np
import jax
import jax.numpy as jnp
from jax.experimental import pallas as pl
from jax.experimental.pallas import tpu as pltpu


def _round_up(x, m):
    return ((x + m - 1) // m) * m


def chamfer_kernel(s_ref, g_ref, out_ref, *, thr, std_x, std_y, std_vis):
    """One grid step processes G pairs.

    s_ref / g_ref: (6, n, G) raw (normalized) particle columns [x, y, vis5..vis8],
                   pairs in the lane dimension.
    out_ref:       (1, G) per-pair chamfer reward.
    std folding:   unnormalize(x) = x*std + mean; mean cancels in every distance,
                   so only std enters (as compile-time constants).
    """
    f32 = jnp.float32
    n = s_ref.shape[1]
    G = s_ref.shape[2]

    sx = s_ref[0]                                   # (n, G) raw state x
    sy = s_ref[1]                                   # (n, G) raw state y
    gx = g_ref[0]                                   # (n, G) raw goal x
    gy = g_ref[1]                                   # (n, G) raw goal y

    # 'l2_simple' pairwise squared-L2 latent distance on unnormalized vis features:
    # P[i, j, p] = sum_d (std_vis[d] * (s_vis[d,i,p] - g_vis[d,j,p]))^2
    # rows i = state particle, cols j = goal particle, p = pair (lane).
    sv = s_ref[2] * std_vis[0]
    gv = g_ref[2] * std_vis[0]
    diff = sv[:, None, :] - gv[None, :, :]          # (n, n, G)
    P = diff * diff
    for d in range(1, 4):
        sv = s_ref[2 + d] * std_vis[d]
        gv = g_ref[2 + d] * std_vis[d]
        diff = sv[:, None, :] - gv[None, :, :]
        P = P + diff * diff

    row_iota = jax.lax.broadcasted_iota(jnp.int32, (n, n, G), 0).astype(f32)  # state idx i
    col_iota = jax.lax.broadcasted_iota(jnp.int32, (n, n, G), 1).astype(f32)  # goal  idx j
    big = f32(n)
    inv_n = f32(1.0 / n)        # no masks -> n_object_particles == n

    # ---- direction 1: goal -> state (torch: min over the state dim of P) ----
    min1 = jnp.min(P, axis=0, keepdims=True)                      # (1, n, G)
    idx1 = jnp.min(jnp.where(P == min1, row_iota, big),
                   axis=0, keepdims=True)                         # first argmin (torch tie-break)
    oh1 = (row_iota == idx1).astype(f32)                          # (n, n, G) one-hot over state i
    mx1 = jnp.sum(oh1 * sx[:, None, :], axis=0)                   # (n, G) matched state x per goal
    my1 = jnp.sum(oh1 * sy[:, None, :], axis=0)
    dx1 = (gx - mx1) * std_x
    dy1 = (gy - my1) * std_y
    xy1 = jnp.sqrt(dx1 * dx1 + dy1 * dy1)                         # L2 (dist_norm=2)
    xy1 = jnp.where(min1[0] > thr, f32(1.0), xy1)                 # latent dist > threshold -> 1
    r_g2s = -jnp.sum(xy1, axis=0, keepdims=True) * inv_n          # (1, G)

    # ---- direction 2: state -> goal (torch: min over the goal dim of P) ----
    min2 = jnp.min(P, axis=1, keepdims=True)                      # (n, 1, G)
    idx2 = jnp.min(jnp.where(P == min2, col_iota, big),
                   axis=1, keepdims=True)
    oh2 = (col_iota == idx2).astype(f32)                          # (n, n, G) one-hot over goal j
    mx2 = jnp.sum(oh2 * gx[None, :, :], axis=1)                   # (n, G) matched goal x per state
    my2 = jnp.sum(oh2 * gy[None, :, :], axis=1)
    dx2 = (sx - mx2) * std_x
    dy2 = (sy - my2) * std_y
    xy2 = jnp.sqrt(dx2 * dx2 + dy2 * dy2)
    xy2 = jnp.where(min2[:, 0, :] > thr, f32(1.0), xy2)
    r_s2g = -jnp.sum(xy2, axis=0, keepdims=True) * inv_n          # (1, G)

    out_ref[...] = f32(0.5) * (r_g2s + r_s2g)                     # lane-dense (1, G) row


def chamfer_reward(achieved, desired, norm_mean, norm_std, *,
                   reward_scale=1.0, latent_dist_threshold=6.0,
                   dist_norm=2, unnormalize=True):
    """ChamferReward.forward for the default config (smorl=False, latent_classifier=None).

    norm_mean / norm_std must be concrete (host) values: mean cancels and is unused;
    std is baked into the kernel as compile-time constants.
    """
    assert dist_norm == 2
    achieved = achieved.astype(jnp.float32)
    desired = desired.astype(jnp.float32)
    bs, n_views, n, fdim = achieved.shape
    B = bs * n_views

    del norm_mean  # cancels algebraically in every distance term
    if unnormalize:
        std = np.asarray(norm_std, dtype=np.float32).reshape(fdim)
    else:
        std = np.ones((fdim,), np.float32)
    std_x, std_y = float(std[0]), float(std[1])
    std_vis = tuple(float(std[5 + d]) for d in range(4))

    # Pack only the used columns [x, y, vis5..vis8] and put the pair axis in lanes:
    # (bs, n_views, n, fdim) -> (6, n, B).
    def pack(x):
        x = x.reshape(B, n, fdim)
        cols = jnp.concatenate([x[..., 0:2], x[..., 5:9]], axis=-1)   # (B, n, 6)
        return jnp.transpose(cols, (2, 1, 0))                          # (6, n, B)

    s = pack(achieved)
    g = pack(desired)

    # Pairs per grid step: lane-aligned (multiple of 128), large enough to amortize
    # the per-step fixed cost, but >=2 grid steps when possible so the 'parallel'
    # axis can shard across v7x's two TensorCores.
    B128 = _round_up(B, 128)
    if B128 <= 128:
        G = 128
    else:
        G = min(1024, _round_up(B128 // 2, 128))
    B_pad = _round_up(B, G)
    if B_pad != B:
        pad = ((0, 0), (0, 0), (0, B_pad - B))
        s = jnp.pad(s, pad)
        g = jnp.pad(g, pad)

    kern = functools.partial(chamfer_kernel, thr=float(latent_dist_threshold),
                             std_x=std_x, std_y=std_y, std_vis=std_vis)

    out = pl.pallas_call(
        kern,
        out_shape=jax.ShapeDtypeStruct((1, B_pad), jnp.float32),
        grid=(B_pad // G,),
        in_specs=[
            pl.BlockSpec((6, n, G), lambda i: (0, 0, i)),   # raw state columns (xy + vis)
            pl.BlockSpec((6, n, G), lambda i: (0, 0, i)),   # raw goal  columns (xy + vis)
        ],
        out_specs=pl.BlockSpec((1, G), lambda i: (0, i)),
        compiler_params=pltpu.CompilerParams(
            dimension_semantics=("parallel",)),
    )(s, g)

    reward_pair = out[0, :B].reshape(bs, n_views)   # per (batch, view) reward
    reward = jnp.mean(reward_pair, axis=1)          # torch: mean over views
    return reward_scale * reward[:, None]           # (bs, 1)


def reference_numpy(achieved, desired, mean, std, reward_scale=1.0, thr=6.0):
    """Pure-NumPy mirror of ChamferReward.forward (latent_classifier=None, smorl=False)."""
    s = achieved.astype(np.float32) * std + mean
    g = desired.astype(np.float32) * std + mean
    bs, nv, n, _ = s.shape
    smask = np.zeros((bs, nv, n), bool)
    gmask = np.zeros((bs, nv, n), bool)
    reward_view = np.zeros((nv, bs), np.float32)
    for v in range(nv):
        for b in range(bs):
            x, y = s[b, v, :, 5:9], g[b, v, :, 5:9]
            sxy, gxy = s[b, v, :, :2], g[b, v, :, :2]
            xx, yy = (x * x).sum(-1), (y * y).sum(-1)
            P = xx[:, None] + yy[None, :] - 2.0 * (x @ y.T)   # (n_state, n_goal), 'l2_simple'
            pm = smask[b, v][:, None] | gmask[b, v][None, :]
            P = np.where(pm, np.inf, P)
            # goal -> state
            min1, idx1 = P.min(axis=0), P.argmin(axis=0)
            xy1 = np.linalg.norm(gxy - sxy[idx1], axis=-1)
            xy1 = np.where(min1 > thr, 1.0, xy1)
            xy1 = np.where(gmask[b, v], 0.0, xy1)
            r_g2s = -xy1.sum() / max(int((~gmask[b, v]).sum()), 1)
            # state -> goal
            min2, idx2 = P.min(axis=1), P.argmin(axis=1)
            xy2 = np.linalg.norm(sxy - gxy[idx2], axis=-1)
            xy2 = np.where(min2 > thr, 1.0, xy2)
            xy2 = np.where(smask[b, v], 0.0, xy2)
            r_s2g = -xy2.sum() / max(int((~smask[b, v]).sum()), 1)
            r = 0.5 * (r_g2s + r_s2g)
            if gmask[b, v].all() or smask[b, v].all():
                r = -1.0
            reward_view[v, b] = r
    reward = reward_view.mean(axis=0)
    return reward_scale * reward[:, None]


if __name__ == "__main__":
    bs, n_views, n_particles, fdim = 2, 2, 8, 10
    key = jax.random.PRNGKey(0)
    k1, k2 = jax.random.split(key)

    # Deterministic synthetic normalizer parameters (unnormalize(x) = x*std + mean).
    norm_mean = 0.25 * (np.arange(fdim, dtype=np.float32) % 4)
    norm_std = np.full((fdim,), 0.5, np.float32)

    # Grid-valued *unnormalized* particles (multiples of 0.25 in [0, 2]) so the kernel
    # and the float32 reference agree exactly on min/argmin/threshold decisions; the
    # stored observation is the normalized version (the module unnormalizes it).
    ach_un = 0.25 * jax.random.randint(k1, (bs, n_views, n_particles, fdim), 0, 9).astype(jnp.float32)
    des_un = 0.25 * jax.random.randint(k2, (bs, n_views, n_particles, fdim), 0, 9).astype(jnp.float32)
    achieved = (ach_un - norm_mean) / norm_std   # obs['achieved_goal']
    desired = (des_un - norm_mean) / norm_std    # obs['desired_goal']

    out = chamfer_reward(achieved, desired, norm_mean, norm_std,
                         reward_scale=1.0, latent_dist_threshold=6.0)
    out = jax.block_until_ready(out)

    ref = reference_numpy(np.asarray(achieved), np.asarray(desired),
                          norm_mean, norm_std, reward_scale=1.0, thr=6.0)
    assert out.shape == (bs, 1)
    np.testing.assert_allclose(np.asarray(out), ref, rtol=1e-4, atol=1e-4)
    print("KERNEL_OK")
</pallas_src>

<mosaic_0001>
module attributes {stable_mosaic.version = 11 : i64} {
  func.func @chamfer_kernel(%arg0: i32, %arg1: memref<6x8x128xf32, #tpu.memory_space<vmem>>, %arg2: memref<6x8x128xf32, #tpu.memory_space<vmem>>, %arg3: memref<1x128xf32, #tpu.memory_space<vmem>>) attributes {dimension_semantics = [#tpu.dimension_semantics<parallel>], iteration_bounds = array<i64: 1>, scalar_prefetch = 0 : i64, scratch_operands = 0 : i64, tpu.core_type = #tpu.core_type<tc>, window_params = [{transform_indices = @transform_0, window_bounds = array<i64: 6, 8, 128>}, {transform_indices = @transform_1, window_bounds = array<i64: 6, 8, 128>}, {transform_indices = @transform_2, window_bounds = array<i64: 1, 128>}]} {
    %c0 = arith.constant 0 : index
    %c0_0 = arith.constant 0 : index
    %c0_1 = arith.constant 0 : index
    %0 = vector.load %arg1[%c0, %c0_0, %c0_1] : memref<6x8x128xf32, #tpu.memory_space<vmem>>, vector<1x8x128xf32>
    %1 = vector.shape_cast %0 : vector<1x8x128xf32> to vector<8x128xf32>
    %c1 = arith.constant 1 : index
    %c0_2 = arith.constant 0 : index
    %c0_3 = arith.constant 0 : index
    %2 = vector.load %arg1[%c1, %c0_2, %c0_3] : memref<6x8x128xf32, #tpu.memory_space<vmem>>, vector<1x8x128xf32>
    %3 = vector.shape_cast %2 : vector<1x8x128xf32> to vector<8x128xf32>
    %c0_4 = arith.constant 0 : index
    %c0_5 = arith.constant 0 : index
    %c0_6 = arith.constant 0 : index
    %4 = vector.load %arg2[%c0_4, %c0_5, %c0_6] : memref<6x8x128xf32, #tpu.memory_space<vmem>>, vector<1x8x128xf32>
    %5 = vector.shape_cast %4 : vector<1x8x128xf32> to vector<8x128xf32>
    %c1_7 = arith.constant 1 : index
    %c0_8 = arith.constant 0 : index
    %c0_9 = arith.constant 0 : index
    %6 = vector.load %arg2[%c1_7, %c0_8, %c0_9] : memref<6x8x128xf32, #tpu.memory_space<vmem>>, vector<1x8x128xf32>
    %7 = vector.shape_cast %6 : vector<1x8x128xf32> to vector<8x128xf32>
    %c2 = arith.constant 2 : index
    %c0_10 = arith.constant 0 : index
    %c0_11 = arith.constant 0 : index
    %8 = vector.load %arg1[%c2, %c0_10, %c0_11] : memref<6x8x128xf32, #tpu.memory_space<vmem>>, vector<1x8x128xf32>
    %9 = vector.shape_cast %8 : vector<1x8x128xf32> to vector<8x128xf32>
    %cst = arith.constant 5.000000e-01 : f32
    %10 = vector.broadcast %cst : f32 to vector<8x128xf32>
    %11 = arith.mulf %9, %10 : vector<8x128xf32>
    %c2_12 = arith.constant 2 : index
    %c0_13 = arith.constant 0 : index
    %c0_14 = arith.constant 0 : index
    %12 = vector.load %arg2[%c2_12, %c0_13, %c0_14] : memref<6x8x128xf32, #tpu.memory_space<vmem>>, vector<1x8x128xf32>
    %13 = vector.shape_cast %12 : vector<1x8x128xf32> to vector<8x128xf32>
    %cst_15 = arith.constant 5.000000e-01 : f32
    %14 = vector.broadcast %cst_15 : f32 to vector<8x128xf32>
    %15 = arith.mulf %13, %14 : vector<8x128xf32>
    %16 = vector.shape_cast %11 : vector<8x128xf32> to vector<8x1x128xf32>
    %17 = vector.shape_cast %15 : vector<8x128xf32> to vector<1x8x128xf32>
    %18 = vector.broadcast %16 : vector<8x1x128xf32> to vector<8x8x128xf32>
    %19 = vector.broadcast %17 : vector<1x8x128xf32> to vector<8x8x128xf32>
    %20 = arith.subf %18, %19 : vector<8x8x128xf32>
    %21 = arith.mulf %20, %20 : vector<8x8x128xf32>
    %c3 = arith.constant 3 : index
    %c0_16 = arith.constant 0 : index
    %c0_17 = arith.constant 0 : index
    %22 = vector.load %arg1[%c3, %c0_16, %c0_17] : memref<6x8x128xf32, #tpu.memory_space<vmem>>, vector<1x8x128xf32>
    %23 = vector.shape_cast %22 : vector<1x8x128xf32> to vector<8x128xf32>
    %cst_18 = arith.constant 5.000000e-01 : f32
    %24 = vector.broadcast %cst_18 : f32 to vector<8x128xf32>
    %25 = arith.mulf %23, %24 : vector<8x128xf32>
    %c3_19 = arith.constant 3 : index
    %c0_20 = arith.constant 0 : index
    %c0_21 = arith.constant 0 : index
    %26 = vector.load %arg2[%c3_19, %c0_20, %c0_21] : memref<6x8x128xf32, #tpu.memory_space<vmem>>, vector<1x8x128xf32>
    %27 = vector.shape_cast %26 : vector<1x8x128xf32> to vector<8x128xf32>
    %cst_22 = arith.constant 5.000000e-01 : f32
    %28 = vector.broadcast %cst_22 : f32 to vector<8x128xf32>
    %29 = arith.mulf %27, %28 : vector<8x128xf32>
    %30 = vector.shape_cast %25 : vector<8x128xf32> to vector<8x1x128xf32>
    %31 = vector.shape_cast %29 : vector<8x128xf32> to vector<1x8x128xf32>
    %32 = vector.broadcast %30 : vector<8x1x128xf32> to vector<8x8x128xf32>
    %33 = vector.broadcast %31 : vector<1x8x128xf32> to vector<8x8x128xf32>
    %34 = arith.subf %32, %33 : vector<8x8x128xf32>
    %35 = arith.mulf %34, %34 : vector<8x8x128xf32>
    %36 = arith.addf %21, %35 : vector<8x8x128xf32>
    %c4 = arith.constant 4 : index
    %c0_23 = arith.constant 0 : index
    %c0_24 = arith.constant 0 : index
    %37 = vector.load %arg1[%c4, %c0_23, %c0_24] : memref<6x8x128xf32, #tpu.memory_space<vmem>>, vector<1x8x128xf32>
    %38 = vector.shape_cast %37 : vector<1x8x128xf32> to vector<8x128xf32>
    %cst_25 = arith.constant 5.000000e-01 : f32
    %39 = vector.broadcast %cst_25 : f32 to vector<8x128xf32>
    %40 = arith.mulf %38, %39 : vector<8x128xf32>
    %c4_26 = arith.constant 4 : index
    %c0_27 = arith.constant 0 : index
    %c0_28 = arith.constant 0 : index
    %41 = vector.load %arg2[%c4_26, %c0_27, %c0_28] : memref<6x8x128xf32, #tpu.memory_space<vmem>>, vector<1x8x128xf32>
    %42 = vector.shape_cast %41 : vector<1x8x128xf32> to vector<8x128xf32>
    %cst_29 = arith.constant 5.000000e-01 : f32
    %43 = vector.broadcast %cst_29 : f32 to vector<8x128xf32>
    %44 = arith.mulf %42, %43 : vector<8x128xf32>
    %45 = vector.shape_cast %40 : vector<8x128xf32> to vector<8x1x128xf32>
    %46 = vector.shape_cast %44 : vector<8x128xf32> to vector<1x8x128xf32>
    %47 = vector.broadcast %45 : vector<8x1x128xf32> to vector<8x8x128xf32>
    %48 = vector.broadcast %46 : vector<1x8x128xf32> to vector<8x8x128xf32>
    %49 = arith.subf %47, %48 : vector<8x8x128xf32>
    %50 = arith.mulf %49, %49 : vector<8x8x128xf32>
    %51 = arith.addf %36, %50 : vector<8x8x128xf32>
    %c5 = arith.constant 5 : index
    %c0_30 = arith.constant 0 : index
    %c0_31 = arith.constant 0 : index
    %52 = vector.load %arg1[%c5, %c0_30, %c0_31] : memref<6x8x128xf32, #tpu.memory_space<vmem>>, vector<1x8x128xf32>
    %53 = vector.shape_cast %52 : vector<1x8x128xf32> to vector<8x128xf32>
    %cst_32 = arith.constant 5.000000e-01 : f32
    %54 = vector.broadcast %cst_32 : f32 to vector<8x128xf32>
    %55 = arith.mulf %53, %54 : vector<8x128xf32>
    %c5_33 = arith.constant 5 : index
    %c0_34 = arith.constant 0 : index
    %c0_35 = arith.constant 0 : index
    %56 = vector.load %arg2[%c5_33, %c0_34, %c0_35] : memref<6x8x128xf32, #tpu.memory_space<vmem>>, vector<1x8x128xf32>
    %57 = vector.shape_cast %56 : vector<1x8x128xf32> to vector<8x128xf32>
    %cst_36 = arith.constant 5.000000e-01 : f32
    %58 = vector.broadcast %cst_36 : f32 to vector<8x128xf32>
    %59 = arith.mulf %57, %58 : vector<8x128xf32>
    %60 = vector.shape_cast %55 : vector<8x128xf32> to vector<8x1x128xf32>
    %61 = vector.shape_cast %59 : vector<8x128xf32> to vector<1x8x128xf32>
    %62 = vector.broadcast %60 : vector<8x1x128xf32> to vector<8x8x128xf32>
    %63 = vector.broadcast %61 : vector<1x8x128xf32> to vector<8x8x128xf32>
    %64 = arith.subf %62, %63 : vector<8x8x128xf32>
    %65 = arith.mulf %64, %64 : vector<8x8x128xf32>
    %66 = arith.addf %51, %65 : vector<8x8x128xf32>
    %67 = tpu.iota {dimensions = array<i32: 0>} : vector<8x8x128xi32>
    %68 = arith.sitofp %67 : vector<8x8x128xi32> to vector<8x8x128xf32>
    %69 = tpu.iota {dimensions = array<i32: 1>} : vector<8x8x128xi32>
    %70 = arith.sitofp %69 : vector<8x8x128xi32> to vector<8x8x128xf32>
    %cst_37 = arith.constant dense<0x7F800000> : vector<8x128xf32>
    %71 = vector.multi_reduction <minimumf>, %66, %cst_37 [0] : vector<8x8x128xf32> to vector<8x128xf32>
    %72 = vector.shape_cast %71 : vector<8x128xf32> to vector<1x8x128xf32>
    %73 = vector.broadcast %72 : vector<1x8x128xf32> to vector<8x8x128xf32>
    %74 = arith.cmpf oeq, %66, %73 : vector<8x8x128xf32>
    %cst_38 = arith.constant 8.000000e+00 : f32
    %75 = vector.broadcast %cst_38 : f32 to vector<8x8x128xf32>
    %76 = arith.select %74, %68, %75 : vector<8x8x128xi1>, vector<8x8x128xf32>
    %cst_39 = arith.constant dense<0x7F800000> : vector<8x128xf32>
    %77 = vector.multi_reduction <minimumf>, %76, %cst_39 [0] : vector<8x8x128xf32> to vector<8x128xf32>
    %78 = vector.shape_cast %77 : vector<8x128xf32> to vector<1x8x128xf32>
    %79 = vector.broadcast %78 : vector<1x8x128xf32> to vector<8x8x128xf32>
    %80 = arith.cmpf oeq, %68, %79 : vector<8x8x128xf32>
    %81 = arith.extui %80 : vector<8x8x128xi1> to vector<8x8x128xi32>
    %82 = arith.sitofp %81 : vector<8x8x128xi32> to vector<8x8x128xf32>
    %83 = vector.shape_cast %1 : vector<8x128xf32> to vector<8x1x128xf32>
    %84 = vector.broadcast %83 : vector<8x1x128xf32> to vector<8x8x128xf32>
    %85 = arith.mulf %82, %84 : vector<8x8x128xf32>
    %cst_40 = arith.constant dense<0.000000e+00> : vector<8x128xf32>
    %86 = vector.multi_reduction <add>, %85, %cst_40 [0] : vector<8x8x128xf32> to vector<8x128xf32>
    %87 = vector.shape_cast %3 : vector<8x128xf32> to vector<8x1x128xf32>
    %88 = vector.broadcast %87 : vector<8x1x128xf32> to vector<8x8x128xf32>
    %89 = arith.mulf %82, %88 : vector<8x8x128xf32>
    %cst_41 = arith.constant dense<0.000000e+00> : vector<8x128xf32>
    %90 = vector.multi_reduction <add>, %89, %cst_41 [0] : vector<8x8x128xf32> to vector<8x128xf32>
    %91 = arith.subf %5, %86 : vector<8x128xf32>
    %cst_42 = arith.constant 5.000000e-01 : f32
    %92 = vector.broadcast %cst_42 : f32 to vector<8x128xf32>
    %93 = arith.mulf %91, %92 : vector<8x128xf32>
    %94 = arith.subf %7, %90 : vector<8x128xf32>
    %cst_43 = arith.constant 5.000000e-01 : f32
    %95 = vector.broadcast %cst_43 : f32 to vector<8x128xf32>
    %96 = arith.mulf %94, %95 : vector<8x128xf32>
    %97 = arith.mulf %93, %93 : vector<8x128xf32>
    %98 = arith.mulf %96, %96 : vector<8x128xf32>
    %99 = arith.addf %97, %98 : vector<8x128xf32>
    %100 = math.sqrt %99 : vector<8x128xf32>
    %101 = vector.shape_cast %72 : vector<1x8x128xf32> to vector<8x128xf32>
    %cst_44 = arith.constant 6.000000e+00 : f32
    %102 = vector.broadcast %cst_44 : f32 to vector<8x128xf32>
    %103 = arith.cmpf ogt, %101, %102 : vector<8x128xf32>
    %cst_45 = arith.constant 1.000000e+00 : f32
    %104 = vector.broadcast %cst_45 : f32 to vector<8x128xf32>
    %105 = arith.select %103, %104, %100 : vector<8x128xi1>, vector<8x128xf32>
    %cst_46 = arith.constant dense<0.000000e+00> : vector<128xf32>
    %106 = vector.multi_reduction <add>, %105, %cst_46 [0] : vector<8x128xf32> to vector<128xf32>
    %107 = vector.shape_cast %106 : vector<128xf32> to vector<1x128xf32>
    %cst_47 = arith.constant 0.000000e+00 : f32
    %108 = vector.broadcast %cst_47 : f32 to vector<1x128xf32>
    %109 = arith.subf %108, %107 : vector<1x128xf32>
    %cst_48 = arith.constant 1.250000e-01 : f32
    %110 = vector.broadcast %cst_48 : f32 to vector<1x128xf32>
    %111 = arith.mulf %109, %110 : vector<1x128xf32>
    %cst_49 = arith.constant dense<0x7F800000> : vector<8x128xf32>
    %112 = vector.multi_reduction <minimumf>, %66, %cst_49 [1] : vector<8x8x128xf32> to vector<8x128xf32>
    %113 = vector.shape_cast %112 : vector<8x128xf32> to vector<8x1x128xf32>
    %114 = vector.broadcast %113 : vector<8x1x128xf32> to vector<8x8x128xf32>
    %115 = arith.cmpf oeq, %66, %114 : vector<8x8x128xf32>
    %cst_50 = arith.constant 8.000000e+00 : f32
    %116 = vector.broadcast %cst_50 : f32 to vector<8x8x128xf32>
    %117 = arith.select %115, %70, %116 : vector<8x8x128xi1>, vector<8x8x128xf32>
    %cst_51 = arith.constant dense<0x7F800000> : vector<8x128xf32>
    %118 = vector.multi_reduction <minimumf>, %117, %cst_51 [1] : vector<8x8x128xf32> to vector<8x128xf32>
    %119 = vector.shape_cast %118 : vector<8x128xf32> to vector<8x1x128xf32>
    %120 = vector.broadcast %119 : vector<8x1x128xf32> to vector<8x8x128xf32>
    %121 = arith.cmpf oeq, %70, %120 : vector<8x8x128xf32>
    %122 = arith.extui %121 : vector<8x8x128xi1> to vector<8x8x128xi32>
    %123 = arith.sitofp %122 : vector<8x8x128xi32> to vector<8x8x128xf32>
    %124 = vector.shape_cast %5 : vector<8x128xf32> to vector<1x8x128xf32>
    %125 = vector.broadcast %124 : vector<1x8x128xf32> to vector<8x8x128xf32>
    %126 = arith.mulf %123, %125 : vector<8x8x128xf32>
    %cst_52 = arith.constant dense<0.000000e+00> : vector<8x128xf32>
    %127 = vector.multi_reduction <add>, %126, %cst_52 [1] : vector<8x8x128xf32> to vector<8x128xf32>
    %128 = vector.shape_cast %7 : vector<8x128xf32> to vector<1x8x128xf32>
    %129 = vector.broadcast %128 : vector<1x8x128xf32> to vector<8x8x128xf32>
    %130 = arith.mulf %123, %129 : vector<8x8x128xf32>
    %cst_53 = arith.constant dense<0.000000e+00> : vector<8x128xf32>
    %131 = vector.multi_reduction <add>, %130, %cst_53 [1] : vector<8x8x128xf32> to vector<8x128xf32>
    %132 = arith.subf %1, %127 : vector<8x128xf32>
    %cst_54 = arith.constant 5.000000e-01 : f32
    %133 = vector.broadcast %cst_54 : f32 to vector<8x128xf32>
    %134 = arith.mulf %132, %133 : vector<8x128xf32>
    %135 = arith.subf %3, %131 : vector<8x128xf32>
    %cst_55 = arith.constant 5.000000e-01 : f32
    %136 = vector.broadcast %cst_55 : f32 to vector<8x128xf32>
    %137 = arith.mulf %135, %136 : vector<8x128xf32>
    %138 = arith.mulf %134, %134 : vector<8x128xf32>
    %139 = arith.mulf %137, %137 : vector<8x128xf32>
    %140 = arith.addf %138, %139 : vector<8x128xf32>
    %141 = math.sqrt %140 : vector<8x128xf32>
    %142 = vector.shape_cast %113 : vector<8x1x128xf32> to vector<8x128xf32>
    %cst_56 = arith.constant 6.000000e+00 : f32
    %143 = vector.broadcast %cst_56 : f32 to vector<8x128xf32>
    %144 = arith.cmpf ogt, %142, %143 : vector<8x128xf32>
    %cst_57 = arith.constant 1.000000e+00 : f32
    %145 = vector.broadcast %cst_57 : f32 to vector<8x128xf32>
    %146 = arith.select %144, %145, %141 : vector<8x128xi1>, vector<8x128xf32>
    %cst_58 = arith.constant dense<0.000000e+00> : vector<128xf32>
    %147 = vector.multi_reduction <add>, %146, %cst_58 [0] : vector<8x128xf32> to vector<128xf32>
    %148 = vector.shape_cast %147 : vector<128xf32> to vector<1x128xf32>
    %cst_59 = arith.constant 0.000000e+00 : f32
    %149 = vector.broadcast %cst_59 : f32 to vector<1x128xf32>
    %150 = arith.subf %149, %148 : vector<1x128xf32>
    %cst_60 = arith.constant 1.250000e-01 : f32
    %151 = vector.broadcast %cst_60 : f32 to vector<1x128xf32>
    %152 = arith.mulf %150, %151 : vector<1x128xf32>
    %153 = arith.addf %111, %152 : vector<1x128xf32>
    %cst_61 = arith.constant 5.000000e-01 : f32
    %154 = vector.broadcast %cst_61 : f32 to vector<1x128xf32>
    %155 = arith.mulf %154, %153 : vector<1x128xf32>
    %c0_62 = arith.constant 0 : index
    %c0_63 = arith.constant 0 : index
    %156 = vector.load %arg3[%c0_62, %c0_63] : memref<1x128xf32, #tpu.memory_space<vmem>>, vector<1x128xf32>
    tpu.vector_store %arg3[%c0_62, %c0_63], %155 {strides = array<i32>} : memref<1x128xf32, #tpu.memory_space<vmem>>, vector<1x128xf32>,
    return
  }
  func.func @transform_0(%arg0: i32) -> (i32, i32, i32) {
    %c0_i32 = arith.constant 0 : i32
    %c0_i32_0 = arith.constant 0 : i32
    %c0_i32_1 = arith.constant 0 : i32
    return %c0_i32, %c0_i32_0, %arg0 : i32, i32, i32
  }
  func.func @transform_1(%arg0: i32) -> (i32, i32, i32) {
    %c0_i32 = arith.constant 0 : i32
    %c0_i32_0 = arith.constant 0 : i32
    %c0_i32_1 = arith.constant 0 : i32
    return %c0_i32, %c0_i32_0, %arg0 : i32, i32, i32
  }
  func.func @transform_2(%arg0: i32) -> (i32, i32) {
    %c0_i32 = arith.constant 0 : i32
    %c0_i32_0 = arith.constant 0 : i32
    return %c0_i32, %arg0 : i32, i32
  }
}

</mosaic_0001>

<bundles_post_ra>
// kernel: tpu_custom_call.1
= control target key start
LH: loop header
LB: loop body
LE: loop exit
PB: predicated region body
PF: predicated region fallthrough
CT: control target
= control target key end

     0   :  { %7 = vsyncpa [#allocation3], 0  ;;  %s1830_s0 = inlined_call_operand.hbm [shape: f32[6,8,128], index: 0, kind: input, shape index: {}]   ;;  %s1831_s1 = inlined_call_operand.hbm [shape: f32[6,8,128], index: 1, kind: input, shape index: {}]   ;;  %s1832_s2 = inlined_call_operand.hbm [shape: f32[1,128], index: 2, kind: output, shape index: {}]  }
   0x1   :  { %8 = vsyncpa [#allocation6], 0 }
   0x2   :  { %9 = vsyncpa [#allocation4], 0  ;;  %s1312_s9 = smov [#allocation2]   ;;  %s1240_s13 = scalar_lea.hbm %s1830_s0, 768 }
   0x3   :  { %s15_s10 = sshll.u32 %s1312_s9, 4  ;;  %p1241_p0 = scmp.ne.s32.totalorder %s1830_s0, %s1240_s13  ;;  %s16_s10 = int_to_ptr.vmem [resolvable:$true] %s15_s10 }
   0x4   :  { %p1244_p1 = scmp.lt.u32.totalorder %s1240_s13, %s1830_s0 }
   0x6   :  { %p1246_p2 = pnand %p1244_p1, %p1241_p0 }
   0x8   :  { %1249 = shalt.err (!%p1246_p2)
}
   0x9   :  { %s1250_s18 = scalar_lea.vmem %s16_s10, 768  ;;  %p1255_p4 = scmp.lt.s32.totalorder %s16_s10, %s16_s10 }
   0xa   :  { %p1251_p3 = scmp.ne.s32.totalorder %s16_s10, %s1250_s18  ;;  %p1256_p5 = scmp.lt.s32.totalorder %s1250_s18, %s1250_s18 }
   0xc   :  { %p1257_p6 = por %p1256_p5, %p1255_p4 }
   0xe   :  { %p1258_p7 = pnand %p1257_p6, %p1251_p3 }
  0x10   :  { %1261 = shalt.err (!%p1258_p7)
}
  0x11   :  { %s1313_s19 = smov 128   ;;  %s1314_s20 = smov 8  }
  0x12   :  { %21 = dma.hbm_to_vmem [thread:$0]  %s1830_s0, 768, %s16_s10, [#allocation3], %s1313_s19, %s1313_s19, %s1314_s20  }
  0x13   :  { %s1315_s23 = smov [#allocation5]   ;;  %s1262_s27 = scalar_lea.hbm %s1831_s1, 768 }
  0x14   :  { %s27_s24 = sshll.u32 %s1315_s23, 4  ;;  %p1263_p8 = scmp.ne.s32.totalorder %s1831_s1, %s1262_s27  ;;  %s28_s24 = int_to_ptr.vmem [resolvable:$true] %s27_s24 }
  0x15   :  { %p1266_p9 = scmp.lt.u32.totalorder %s1262_s27, %s1831_s1 }
  0x17   :  { %p1268_p10 = pnand %p1266_p9, %p1263_p8 }
  0x19   :  { %1271 = shalt.err (!%p1268_p10)
}
  0x1a   :  { %s1272_s4 = scalar_lea.vmem %s28_s24, 768  ;;  %p1277_p12 = scmp.lt.s32.totalorder %s28_s24, %s28_s24 }
  0x1b   :  { %p1273_p11 = scmp.ne.s32.totalorder %s28_s24, %s1272_s4  ;;  %p1278_p13 = scmp.lt.s32.totalorder %s1272_s4, %s1272_s4 }
  0x1d   :  { %p1279_p0 = por %p1278_p13, %p1277_p12 }
  0x1f   :  { %p1280_p1 = pnand %p1279_p0, %p1273_p11 }
  0x21   :  { %1283 = shalt.err (!%p1280_p1)
}
  0x22   :  { %33 = dma.hbm_to_vmem [thread:$0]  %s1831_s1, 768, %s28_s24, [#allocation6], %s1313_s19, %s1313_s19, %s1314_s20  }
  0x23   :  { %1306 = dma.done.wait [#allocation3], 768  }
  0x24   :  { %1307 = vsyncadd [#allocation3], 4294966528 }
  0x25   :  { %1308 = dma.done.wait [#allocation6], 768  }
  0x26   :  { %1309 = vsyncadd [#allocation6], 4294966528  ;;  %v57_v0 = vlaneseq  ;;  %v1316_v1 = vmov 1966171168   ;;  %v40_v5 = vld [vmem:[#allocation2] sm:$0xff]  ;;  %v1361_v7 = vld [vmem:[#allocation2 + $0x8] sm:$0xff] }
  0x27   :  { %v55_v2 = vunpack.c.l.s4 %v1316_v1  ;;  %v47_v8 = vld [vmem:[#allocation2 + $0x10] sm:$0xff]  ;;  %v50_v9 = vld [vmem:[#allocation5 + $0x10] sm:$0xff]  ;;  %v584_v12 = vcombine.high %v40_v5, %v40_v5  ;;  %v159_v15 = vld [vmem:[#allocation2 + $0x18] sm:$0xff]  ;;  %v689_v19 = vcombine.high %v1361_v7, %v1361_v7  ;;  %s1319_s1 = smov [#allocation7]  }
  0x28   :  { %v58_v4 = vshrl.u32 %v57_v0, 7  ;;  %v48_v13 = vmul.f32 0.5, %v47_v8  ;;  %v51_v14 = vmul.f32 0.5, %v50_v9  ;;  %v162_v16 = vld [vmem:[#allocation5 + $0x18] sm:$0xff]  ;;  %v279_v17 = vld [vmem:[#allocation2 + $0x20] sm:$0xff]  ;;  %v160_v20 = vmul.f32 0.5, %v159_v15 }
  0x29   :  { %v56_v3 = vunpack.c.0.s8 %v55_v2  ;;  %v1372_v21 = vmul.f32 0.5, %v162_v16  ;;  %v280_v22 = vmul.f32 0.5, %v279_v17  ;;  %v282_v23 = vld [vmem:[#allocation5 + $0x20] sm:$0xff]  ;;  %v399_v24 = vld [vmem:[#allocation2 + $0x28] sm:$0xff]  ;;  %v402_v25 = vld [vmem:[#allocation5 + $0x28] sm:$0xff]  ;;  %s1190_s6 = sshll.u32 %s1319_s1, 4  ;;  %s1191_s6 = int_to_ptr.vmem [resolvable:$true] %s1190_s6 }
  0x2a   :  { %v1363_v10 = vsub.s32 0, %v58_v4  ;;  %v1365_v11 = vcvt.s32.f32 %v58_v4  ;;  %v53_v27 = vcombine.high %v48_v13, %v48_v13  ;;  %v1378_v29 = vmul.f32 0.5, %v282_v23  ;;  %s1284_s7 = scalar_lea.vmem %s1191_s6, 16  ;;  %s1288_s8 = scalar_lea.vmem %s1191_s6, 32 }
  0x2b   :  { %v1359_v6 = vsub.s32 %v56_v3, %v58_v4  ;;  %v1380_v30 = vmul.f32 0.5, %v399_v24  ;;  %v165_v31 = vcombine.high %v160_v20, %v160_v20  ;;  %v285_v33 = vcombine.high %v280_v22, %v280_v22  ;;  %p1285_p2 = scmp.ne.s32.totalorder %s1191_s6, %s1284_s7  ;;  %p1289_p3 = scmp.lt.s32.totalorder %s1191_s6, %s1191_s6 }
  0x2c   :  { %v1388_v38 = vmul.f32 0.5, %v402_v25  ;;  %p1290_p4 = scmp.lt.s32.totalorder %s1288_s8, %s1284_s7 }
  0x2d   :  { %v1368_v18 = vrot.slane %v40_v5, %v1359_v6  ;;  %v1375_v26 = vrot.slane %v584_v12, %v1359_v6  ;;  %v60_v28 = vrot.slane %v48_v13, %v1359_v6  ;;  %v172_v32 = vrot.slane %v160_v20, %v1359_v6 }
  0x2e   :  { %v1384_v34 = vrot.slane %v280_v22, %v1359_v6  ;;  %v67_v35 = vrot.slane %v53_v27, %v1359_v6  ;;  %v179_v39 = vrot.slane %v165_v31, %v1359_v6  ;;  %v1393_v42 = vrot.slane %v285_v33, %v1359_v6  ;;  %p1291_p5 = por %p1290_p4, %p1289_p3 }
  0x2f   :  { %v68_v36 = vcombine.high %v60_v28, %v60_v28  ;;  %v76_v37 = vrot.slane %v60_v28, %v1359_v6  ;;  %v180_v40 = vcombine.high %v172_v32, %v172_v32  ;;  %v188_v41 = vrot.slane %v172_v32, %v1359_v6 }
  0x30   :  { %v69_v43 = vcombine.high %v67_v35, %v67_v35  ;;  %v83_v44 = vrot.slane %v67_v35, %v1359_v6  ;;  %v181_v48 = vcombine.high %v179_v39, %v179_v39  ;;  %v195_v49 = vrot.slane %v179_v39, %v1359_v6  ;;  %p1292_p6 = pnand %p1291_p5, %p1285_p2 }
  0x31   :  { %v90_v45 = vrot.slane %v68_v36, %v1359_v6  ;;  %v98_v46 = vcombine.high %v76_v37, %v76_v37  ;;  %v105_v47 = vrot.slane %v76_v37, %v1363_v10  ;;  %v202_v50 = vrot.slane %v180_v40, %v1359_v6 }
  0x32   :  { %v97_v51 = vrot.slane %v69_v43, %v1359_v6  ;;  %v99_v52 = vcombine.high %v83_v44, %v83_v44  ;;  %v121_v56 = vrot.slane %v83_v44, %v1363_v10  ;;  %v209_v58 = vrot.slane %v181_v48, %v1359_v6 }
  0x33   :  { %v100_v53 = vcombine.high %v90_v45, %v90_v45  ;;  %v109_v54 = vrot.slane %v90_v45, %v1363_v10  ;;  %v113_v55 = vrot.slane %v98_v46, %v1363_v10  ;;  %v142_v57 = vsub.f32 %v105_v47, %v51_v14 }
  0x34   :  { %v101_v59 = vcombine.high %v97_v51, %v97_v51  ;;  %v125_v61 = vrot.slane %v97_v51, %v1363_v10  ;;  %v129_v62 = vrot.slane %v99_v52, %v1363_v10  ;;  %v146_v1 = vsub.f32 %v121_v56, %v51_v14 }
  0x35   :  { %v117_v60 = vrot.slane %v100_v53, %v1363_v10  ;;  %v143_v63 = vsub.f32 %v109_v54, %v51_v14  ;;  %v144_v0 = vsub.f32 %v113_v55, %v51_v14  ;;  %v150_v2 = vmul.f32 %v142_v57, %v142_v57 }
  0x36   :  { %v133_v3 = vrot.slane %v101_v59, %v1363_v10  ;;  %v147_v5 = vsub.f32 %v125_v61, %v51_v14  ;;  %v148_v8 = vsub.f32 %v129_v62, %v51_v14  ;;  %v154_v13 = vmul.f32 %v146_v1, %v146_v1 }
  0x37   :  { %v145_v4 = vsub.f32 %v117_v60, %v51_v14  ;;  %v151_v9 = vmul.f32 %v143_v63, %v143_v63  ;;  %v152_v12 = vmul.f32 %v144_v0, %v144_v0  ;;  %v210_v15 = vcombine.high %v188_v41, %v188_v41 }
  0x38   :  { %v149_v16 = vsub.f32 %v133_v3, %v51_v14  ;;  %v155_v20 = vmul.f32 %v147_v5, %v147_v5  ;;  %v156_v22 = vmul.f32 %v148_v8, %v148_v8  ;;  %v211_v23 = vcombine.high %v195_v49, %v195_v49 }
  0x39   :  { %v153_v17 = vmul.f32 %v145_v4, %v145_v4  ;;  %v212_v24 = vcombine.high %v202_v50, %v202_v50  ;;  %v213_v25 = vcombine.high %v209_v58, %v209_v58  ;;  %v217_v27 = vrot.slane %v188_v41, %v1363_v10 }
  0x3a   :  { %v157_v28 = vmul.f32 %v149_v16, %v149_v16  ;;  %v221_v31 = vrot.slane %v202_v50, %v1363_v10  ;;  %v225_v32 = vrot.slane %v210_v15, %v1363_v10  ;;  %v233_v33 = vrot.slane %v195_v49, %v1363_v10 }
  0x3b   :  { %v229_v35 = vrot.slane %v212_v24, %v1363_v10  ;;  %v237_v36 = vrot.slane %v209_v58, %v1363_v10  ;;  %v241_v14 = vrot.slane %v211_v23, %v1363_v10  ;;  %v245_v37 = vrot.slane %v213_v25, %v1363_v10 }
  0x3c   :  { %v254_v39 = vsub.f32 %v217_v27, %v1372_v21  ;;  %v255_v40 = vsub.f32 %v221_v31, %v1372_v21  ;;  %v256_v41 = vsub.f32 %v225_v32, %v1372_v21  ;;  %v258_v43 = vsub.f32 %v233_v33, %v1372_v21 }
  0x3d   :  { %v257_v44 = vsub.f32 %v229_v35, %v1372_v21  ;;  %v259_v45 = vsub.f32 %v237_v36, %v1372_v21  ;;  %v260_v46 = vsub.f32 %v241_v14, %v1372_v21  ;;  %v261_v47 = vsub.f32 %v245_v37, %v1372_v21 }
  0x3e   :  { %v262_v48 = vmul.f32 %v254_v39, %v254_v39  ;;  %v263_v49 = vmul.f32 %v255_v40, %v255_v40  ;;  %v264_v50 = vmul.f32 %v256_v41, %v256_v41  ;;  %v266_v51 = vmul.f32 %v258_v43, %v258_v43 }
  0x3f   :  { %v265_v52 = vmul.f32 %v257_v44, %v257_v44  ;;  %v267_v53 = vmul.f32 %v259_v45, %v259_v45  ;;  %v268_v54 = vmul.f32 %v260_v46, %v260_v46  ;;  %v269_v55 = vmul.f32 %v261_v47, %v261_v47 }
  0x40   :  { %v270_v56 = vadd.f32 %v262_v48, %v150_v2  ;;  %v271_v57 = vadd.f32 %v263_v49, %v151_v9  ;;  %v272_v58 = vadd.f32 %v264_v50, %v152_v12  ;;  %v274_v59 = vadd.f32 %v266_v51, %v154_v13 }
  0x41   :  { %v273_v60 = vadd.f32 %v265_v52, %v153_v17  ;;  %v275_v61 = vadd.f32 %v267_v53, %v155_v20  ;;  %v276_v62 = vadd.f32 %v268_v54, %v156_v22  ;;  %v277_v63 = vadd.f32 %v269_v55, %v157_v28 }
  0x42   :  { %v300_v0 = vcombine.high %v1384_v34, %v1384_v34  ;;  %v301_v21 = vcombine.high %v1393_v42, %v1393_v42  ;;  %v308_v1 = vrot.slane %v1384_v34, %v1359_v6  ;;  %v315_v3 = vrot.slane %v1393_v42, %v1359_v6 }
  0x43   :  { %v405_v2 = vcombine.high %v1380_v30, %v1380_v30  ;;  %v412_v4 = vrot.slane %v1380_v30, %v1359_v6  ;;  %v599_v5 = vcombine.high %v1368_v18, %v1368_v18  ;;  %v600_v8 = vcombine.high %v1375_v26, %v1375_v26 }
  0x44   :  { %v322_v9 = vrot.slane %v300_v0, %v1359_v6  ;;  %v329_v12 = vrot.slane %v301_v21, %v1359_v6  ;;  %v330_v34 = vcombine.high %v308_v1, %v308_v1  ;;  %v331_v13 = vcombine.high %v315_v3, %v315_v3 }
  0x45   :  { %v337_v42 = vrot.slane %v308_v1, %v1363_v10  ;;  %v353_v15 = vrot.slane %v315_v3, %v1363_v10  ;;  %v419_v16 = vrot.slane %v405_v2, %v1359_v6  ;;  %v420_v17 = vcombine.high %v412_v4, %v412_v4 }
  0x46   :  { %v332_v30 = vcombine.high %v322_v9, %v322_v9  ;;  %v333_v20 = vcombine.high %v329_v12, %v329_v12  ;;  %v341_v22 = vrot.slane %v322_v9, %v1363_v10  ;;  %v345_v23 = vrot.slane %v330_v34, %v1363_v10 }
  0x47   :  { %v357_v24 = vrot.slane %v329_v12, %v1363_v10  ;;  %v361_v25 = vrot.slane %v331_v13, %v1363_v10  ;;  %v374_v27 = vsub.f32 %v337_v42, %v1378_v29  ;;  %v378_v28 = vsub.f32 %v353_v15, %v1378_v29 }
  0x48   :  { %v349_v31 = vrot.slane %v332_v30, %v1363_v10  ;;  %v365_v32 = vrot.slane %v333_v20, %v1363_v10  ;;  %v375_v33 = vsub.f32 %v341_v22, %v1378_v29  ;;  %v376_v35 = vsub.f32 %v345_v23, %v1378_v29 }
  0x49   :  { %v379_v36 = vsub.f32 %v357_v24, %v1378_v29  ;;  %v380_v14 = vsub.f32 %v361_v25, %v1378_v29  ;;  %v382_v37 = vmul.f32 %v374_v27, %v374_v27  ;;  %v386_v39 = vmul.f32 %v378_v28, %v378_v28 }
  0x4a   :  { %v377_v40 = vsub.f32 %v349_v31, %v1378_v29  ;;  %v381_v41 = vsub.f32 %v365_v32, %v1378_v29  ;;  %v383_v43 = vmul.f32 %v375_v33, %v375_v33  ;;  %v384_v44 = vmul.f32 %v376_v35, %v376_v35 }
  0x4b   :  { %v387_v45 = vmul.f32 %v379_v36, %v379_v36  ;;  %v388_v46 = vmul.f32 %v380_v14, %v380_v14  ;;  %v390_v47 = vadd.f32 %v382_v37, %v270_v56  ;;  %v394_v48 = vadd.f32 %v386_v39, %v274_v59 }
  0x4c   :  { %v385_v49 = vmul.f32 %v377_v40, %v377_v40  ;;  %v389_v50 = vmul.f32 %v381_v41, %v381_v41  ;;  %v391_v51 = vadd.f32 %v383_v43, %v271_v57  ;;  %v392_v52 = vadd.f32 %v384_v44, %v272_v58 }
  0x4d   :  { %v395_v53 = vadd.f32 %v387_v45, %v275_v61  ;;  %v396_v54 = vadd.f32 %v388_v46, %v276_v62  ;;  %v421_v55 = vcombine.high %v419_v16, %v419_v16  ;;  %v428_v0 = vrot.slane %v412_v4, %v1359_v6 }
  0x4e   :  { %v393_v21 = vadd.f32 %v385_v49, %v273_v60  ;;  %v397_v1 = vadd.f32 %v389_v50, %v277_v63  ;;  %v435_v3 = vrot.slane %v419_v16, %v1359_v6  ;;  %v442_v29 = vrot.slane %v420_v17, %v1359_v6 }
  0x4f   :  { %v449_v2 = vrot.slane %v421_v55, %v1359_v6  ;;  %v450_v9 = vcombine.high %v428_v0, %v428_v0  ;;  %v457_v56 = vrot.slane %v428_v0, %v1363_v10  ;;  %v1467_v57 = vrot.slane %v1368_v18, %v1359_v6 }
  0x50   :  { %v451_v58 = vcombine.high %v435_v3, %v435_v3  ;;  %v452_v59 = vcombine.high %v442_v29, %v442_v29  ;;  %v461_v61 = vrot.slane %v442_v29, %v1363_v10  ;;  %v473_v60 = vrot.slane %v435_v3, %v1363_v10 }
  0x51   :  { %v453_v62 = vcombine.high %v449_v2, %v449_v2  ;;  %v465_v63 = vrot.slane %v450_v9, %v1363_v10  ;;  %v477_v4 = vrot.slane %v449_v2, %v1363_v10  ;;  %v494_v12 = vsub.f32 %v457_v56, %v1388_v38 }
  0x52   :  { %v469_v34 = vrot.slane %v452_v59, %v1363_v10  ;;  %v481_v13 = vrot.slane %v451_v58, %v1363_v10  ;;  %v495_v42 = vsub.f32 %v461_v61, %v1388_v38  ;;  %v498_v15 = vsub.f32 %v473_v60, %v1388_v38 }
  0x53   :  { %v485_v16 = vrot.slane %v453_v62, %v1363_v10  ;;  %v496_v17 = vsub.f32 %v465_v63, %v1388_v38  ;;  %v499_v30 = vsub.f32 %v477_v4, %v1388_v38  ;;  %v502_v20 = vmul.f32 %v494_v12, %v494_v12 }
  0x54   :  { %v497_v22 = vsub.f32 %v469_v34, %v1388_v38  ;;  %v500_v23 = vsub.f32 %v481_v13, %v1388_v38  ;;  %v503_v24 = vmul.f32 %v495_v42, %v495_v42  ;;  %v506_v25 = vmul.f32 %v498_v15, %v498_v15 }
  0x55   :  { %v501_v27 = vsub.f32 %v485_v16, %v1388_v38  ;;  %v504_v28 = vmul.f32 %v496_v17, %v496_v17  ;;  %v507_v31 = vmul.f32 %v499_v30, %v499_v30  ;;  %v1484_v32 = vadd.f32 %v502_v20, %v390_v47 }
  0x56   :  { %v505_v33 = vmul.f32 %v497_v22, %v497_v22  ;;  %v508_v35 = vmul.f32 %v500_v23, %v500_v23  ;;  %v1486_v36 = vadd.f32 %v503_v24, %v391_v51  ;;  %v1488_v14 = vadd.f32 %v506_v25, %v394_v48 }
  0x57   :  { %v509_v37 = vmul.f32 %v501_v27, %v501_v27  ;;  %v1490_v39 = vadd.f32 %v504_v28, %v392_v52  ;;  %v1492_v40 = vadd.f32 %v507_v31, %v395_v53  ;;  %v1496_v41 = vrot.slane %v1375_v26, %v1359_v6 }
  0x58   :  { %v1498_v38 = vadd.f32 %v505_v33, %v393_v21  ;;  %v1500_v43 = vadd.f32 %v508_v35, %v396_v54  ;;  %v529_v44 = vmin.f32 %v1484_v32, %v1488_v14  ;;  %v1508_v45 = vrot.slane %v599_v5, %v1359_v6 }
  0x59   :  { %v1510_v46 = vadd.f32 %v509_v37, %v397_v1  ;;  %v530_v47 = vmin.f32 %v1486_v36, %v1492_v40  ;;  %v1518_v48 = vrot.slane %v600_v8, %v1359_v6  ;;  %v629_v49 = vcombine.high %v1467_v57, %v1467_v57 }
  0x5a   :  { %v531_v50 = vmin.f32 %v1490_v39, %v1500_v43  ;;  %v630_v18 = vcombine.high %v1496_v41, %v1496_v41  ;;  %v631_v5 = vcombine.high %v1508_v45, %v1508_v45  ;;  %v696_v51 = vrot.slane %v1361_v7, %v1359_v6 }
  0x5b   :  { %v532_v26 = vmin.f32 %v1498_v38, %v1510_v46  ;;  %v533_v8 = vmin.f32 %v529_v44, %v530_v47  ;;  %v632_v52 = vcombine.high %v1518_v48, %v1518_v48  ;;  %v636_v53 = vrot.slane %v1467_v57, %v1363_v10 }
  0x5c   :  { %v640_v54 = vrot.slane %v1508_v45, %v1363_v10  ;;  %v1539_v55 = vrot.slane %v629_v49, %v1363_v10  ;;  %v1542_v0 = vrot.slane %v631_v5, %v1363_v10  ;;  %v652_v21 = vrot.slane %v1496_v41, %v1363_v10 }
  0x5d   :  { %v534_v1 = vmin.f32 %v531_v50, %v532_v26  ;;  %v1547_v3 = vrot.slane %v630_v18, %v1363_v10  ;;  %v1550_v29 = vrot.slane %v632_v52, %v1363_v10  ;;  %v703_v2 = vrot.slane %v689_v19, %v1359_v6 }
  0x5e   :  { %v656_v9 = vrot.slane %v1518_v48, %v1363_v10  ;;  %v704_v56 = vcombine.high %v696_v51, %v696_v51  ;;  %v1559_v58 = vrot.slane %v696_v51, %v1359_v6  ;;  %v817_v59 = vrot.slane %v1484_v32, 4 }
  0x5f   :  { %v1562_v61 = vmin.f32 %v533_v8, %v534_v1  ;;  %v705_v60 = vcombine.high %v703_v2, %v703_v2  ;;  %v1565_v62 = vrot.slane %v703_v2, %v1359_v6  ;;  %v823_v63 = vrot.slane %v1486_v36, 4 }
  0x60   :  { %v1569_v7 = vrot.slane %v704_v56, %v1359_v6  ;;  %v734_v19 = vcombine.high %v1559_v58, %v1559_v58  ;;  %v1574_v4 = vmin.f32 %v1484_v32, %v817_v59  ;;  %v829_v12 = vrot.slane %v1490_v39, 4 }
  0x61   :  { %vm536_vm0 = vcmp.eq.f32.partialorder %v1484_v32, %v1562_v61  ;;  %vm537_vm1 = vcmp.eq.f32.partialorder %v1486_v36, %v1562_v61  ;;  %vm538_vm2 = vcmp.eq.f32.partialorder %v1490_v39, %v1562_v61  ;;  %vm539_vm3 = vcmp.eq.f32.partialorder %v1498_v38, %v1562_v61 }
  0x62   :  { %vm540_vm4 = vcmp.eq.f32.partialorder %v1488_v14, %v1562_v61  ;;  %vm541_vm5 = vcmp.eq.f32.partialorder %v1492_v40, %v1562_v61  ;;  %vm542_vm6 = vcmp.eq.f32.partialorder %v1500_v43, %v1562_v61  ;;  %vm543_vm7 = vcmp.eq.f32.partialorder %v1510_v46, %v1562_v61 }
  0x63   :  { %v1317_v34 = vmov 8.0   ;;  %v733_v28 = vrot.slane %v705_v60, %v1359_v6  ;;  %v735_v31 = vcombine.high %v1565_v62, %v1565_v62  ;;  %v736_v33 = vcombine.high %v1569_v7, %v1569_v7 }
  0x64   :  { %v544_v13 = vsel %vm536_vm0, 0.0, %v1317_v34  ;;  %v545_v42 = vsel %vm537_vm1, 1.0, %v1317_v34  ;;  %v546_v15 = vsel %vm538_vm2, 2.0, %v1317_v34  ;;  %v547_v16 = vsel %vm539_vm3, 3.0, %v1317_v34 }
  0x65   :  { %v548_v17 = vsel %vm540_vm4, 4.0, %v1317_v34  ;;  %v549_v30 = vsel %vm541_vm5, 5.0, %v1317_v34  ;;  %v550_v20 = vsel %vm542_vm6, 6.0, %v1317_v34  ;;  %v551_v22 = vsel %vm543_vm7, 7.0, %v1317_v34 }
  0x66   :  { %v552_v23 = vmin.f32 %v544_v13, %v548_v17  ;;  %v553_v24 = vmin.f32 %v545_v42, %v549_v30  ;;  %v554_v25 = vmin.f32 %v546_v15, %v550_v20  ;;  %v555_v27 = vmin.f32 %v547_v16, %v551_v22 }
  0x67   :  { %v741_v35 = vrot.slane %v1559_v58, %v1363_v10  ;;  %v745_v47 = vrot.slane %v1569_v7, %v1363_v10  ;;  %v749_v49 = vrot.slane %v734_v19, %v1363_v10  ;;  %v737_v50 = vcombine.high %v733_v28, %v733_v28 }
  0x68   :  { %v556_v37 = vmin.f32 %v552_v23, %v553_v24  ;;  %v557_v44 = vmin.f32 %v554_v25, %v555_v27  ;;  %v753_v18 = vrot.slane %v736_v33, %v1363_v10  ;;  %v757_v6 = vrot.slane %v1565_v62, %v1363_v10 }
  0x69   :  { %v765_v5 = vrot.slane %v735_v31, %v1363_v10  ;;  %v761_v26 = vrot.slane %v733_v28, %v1363_v10  ;;  %v819_v8 = vrot.slane %v1574_v4, 2  ;;  %v824_v52 = vmin.f32 %v1486_v36, %v823_v63 }
  0x6a   :  { %v558_v51 = vmin.f32 %v556_v37, %v557_v44  ;;  %v769_v1 = vrot.slane %v737_v50, %v1363_v10  ;;  %v830_v2 = vmin.f32 %v1490_v39, %v829_v12  ;;  %v835_v56 = vrot.slane %v1498_v38, 4 }
  0x6b   :  { %v841_v58 = vrot.slane %v1488_v14, 4  ;;  %v1318_v59 = vmov 0.0   ;;  %v825_v31 = vrot.slane %v824_v52, 2 }
  0x6c   :  { %vm1200_vm8 = vcmp.eq.f32.partialorder %v558_v51, 0.0  ;;  %vm1201_vm9 = vcmp.eq.f32.partialorder %v558_v51, 1.0  ;;  %vm1202_vm10 = vcmp.eq.f32.partialorder %v558_v51, 2.0  ;;  %vm1203_vm11 = vcmp.eq.f32.partialorder %v558_v51, 3.0 }
  0x6d   :  { %vm1204_vm12 = vcmp.eq.f32.partialorder %v558_v51, 4.0  ;;  %vm1205_vm13 = vcmp.eq.f32.partialorder %v558_v51, 5.0  ;;  %vm1206_vm14 = vcmp.eq.f32.partialorder %v558_v51, 6.0  ;;  %vm1207_vm15 = vcmp.eq.f32.partialorder %v558_v51, 7.0 }
  0x6e   :  { %v1208_v60 = vsel %vm1200_vm8, 1.0, %v1318_v59  ;;  %v1209_v62 = vsel %vm1201_vm9, 1.0, %v1318_v59  ;;  %v1210_v63 = vsel %vm1202_vm10, 1.0, %v1318_v59  ;;  %v1211_v7 = vsel %vm1203_vm11, 1.0, %v1318_v59 }
  0x6f   :  { %v1212_v19 = vsel %vm1204_vm12, 1.0, %v1318_v59  ;;  %v1213_v12 = vsel %vm1205_vm13, 1.0, %v1318_v59  ;;  %v1214_v34 = vsel %vm1206_vm14, 1.0, %v1318_v59  ;;  %v1215_v13 = vsel %vm1207_vm15, 1.0, %v1318_v59 }
  0x70   :  { %v673_v42 = vmul.f32 %v1208_v60, %v636_v53  ;;  %v674_v15 = vmul.f32 %v1209_v62, %v640_v54  ;;  %v675_v16 = vmul.f32 %v1210_v63, %v1539_v55  ;;  %v676_v17 = vmul.f32 %v1211_v7, %v1542_v0 }
  0x71   :  { %v677_v30 = vmul.f32 %v1212_v19, %v652_v21  ;;  %v678_v20 = vmul.f32 %v1213_v12, %v656_v9  ;;  %v679_v22 = vmul.f32 %v1214_v34, %v1547_v3  ;;  %v680_v57 = vmul.f32 %v1215_v13, %v1550_v29 }
  0x72   :  { %v681_v53 = vadd.f32 %v674_v15, %v673_v42  ;;  %v778_v23 = vmul.f32 %v1208_v60, %v741_v35  ;;  %v779_v45 = vmul.f32 %v1209_v62, %v745_v47  ;;  %v780_v54 = vmul.f32 %v1210_v63, %v749_v49 }
  0x73   :  { %v781_v24 = vmul.f32 %v1211_v7, %v753_v18  ;;  %v782_v55 = vmul.f32 %v1212_v19, %v757_v6  ;;  %v783_v25 = vmul.f32 %v1213_v12, %v761_v26  ;;  %v784_v0 = vmul.f32 %v1214_v34, %v765_v5 }
  0x74   :  { %v682_v27 = vadd.f32 %v681_v53, %v675_v16  ;;  %v785_v28 = vmul.f32 %v1215_v13, %v769_v1  ;;  %v786_v41 = vadd.f32 %v779_v45, %v778_v23  ;;  %v820_v21 = vmin.f32 %v1574_v4, %v819_v8  ;;  %v1658_v53 = vld [vmem:[#allocation5] sm:$0xff] }
  0x75   :  { %v831_v10 = vrot.slane %v830_v2, 2  ;;  %v836_v48 = vmin.f32 %v1498_v38, %v835_v56  ;;  %v842_v3 = vmin.f32 %v1488_v14, %v841_v58  ;;  %v847_v35 = vrot.slane %v1492_v40, 4 }
  0x76   :  { %v683_v29 = vadd.f32 %v682_v27, %v676_v17  ;;  %v787_v9 = vadd.f32 %v786_v41, %v780_v54  ;;  %v821_v33 = vrot.slane %v820_v21, 1  ;;  %v826_v37 = vmin.f32 %v824_v52, %v825_v31 }
  0x77   :  { %v832_v44 = vmin.f32 %v830_v2, %v831_v10  ;;  %v837_v47 = vrot.slane %v836_v48, 2  ;;  %v843_v49 = vrot.slane %v842_v3, 2  ;;  %v848_v4 = vmin.f32 %v1492_v40, %v847_v35 }
  0x78   :  { %v684_v50 = vadd.f32 %v683_v29, %v677_v30  ;;  %v788_v18 = vadd.f32 %v787_v9, %v781_v24  ;;  %v1642_v6 = vmin.f32 %v820_v21, %v821_v33  ;;  %v827_v5 = vrot.slane %v826_v37, 1  ;;  %v1670_v24 = vld [vmem:[#allocation5 + $0x8] sm:$0xff] }
  0x79   :  { %v833_v51 = vrot.slane %v832_v44, 1  ;;  %v838_v26 = vmin.f32 %v836_v48, %v837_v47  ;;  %v844_v8 = vmin.f32 %v842_v3, %v843_v49  ;;  %v849_v58 = vrot.slane %v848_v4, 2 }
  0x7a   :  { %v685_v1 = vadd.f32 %v684_v50, %v678_v20  ;;  %v789_v56 = vadd.f32 %v788_v18, %v782_v55  ;;  %v853_v60 = vrot.slane %v1500_v43, 4  ;;  %v1646_v62 = vmin.f32 %v826_v37, %v827_v5 }
  0x7b   :  { %v1648_v52 = vmin.f32 %v832_v44, %v833_v51  ;;  %v839_v2 = vrot.slane %v838_v26, 1  ;;  %v845_v63 = vrot.slane %v844_v8, 1  ;;  %v850_v12 = vmin.f32 %v848_v4, %v849_v58 }
  0x7c   :  { %v686_v7 = vadd.f32 %v685_v1, %v679_v22  ;;  %v790_v19 = vadd.f32 %v789_v56, %v783_v25  ;;  %v854_v34 = vmin.f32 %v1500_v43, %v853_v60  ;;  %v859_v15 = vrot.slane %v1510_v46, 4 }
  0x7d   :  { %v1651_v13 = vmin.f32 %v838_v26, %v839_v2  ;;  %v1653_v42 = vmin.f32 %v844_v8, %v845_v63  ;;  %vm865_vm0 = vcmp.eq.f32.partialorder %v1484_v32, %v1642_v6  ;;  %v851_v30 = vrot.slane %v850_v12, 1 }
  0x7e   :  { %v687_v16 = vadd.f32 %v686_v7, %v680_v57  ;;  %v791_v17 = vadd.f32 %v790_v19, %v784_v0  ;;  %v855_v20 = vrot.slane %v854_v34, 2  ;;  %v860_v22 = vmin.f32 %v1510_v46, %v859_v15 }
  0x7f   :  { %vm866_vm1 = vcmp.eq.f32.partialorder %v1486_v36, %v1646_v62  ;;  %vm867_vm2 = vcmp.eq.f32.partialorder %v1490_v39, %v1648_v52  ;;  %vm868_vm3 = vcmp.eq.f32.partialorder %v1498_v38, %v1651_v13  ;;  %v1668_v57 = vmin.f32 %v850_v12, %v851_v30 }
  0x80   :  { %v792_v23 = vadd.f32 %v791_v17, %v785_v28  ;;  %v793_v45 = vsub.f32 %v1658_v53, %v687_v16  ;;  %v856_v54 = vmin.f32 %v854_v34, %v855_v20  ;;  %v861_v55 = vrot.slane %v860_v22, 2 }
  0x81   :  { %vm869_vm4 = vcmp.eq.f32.partialorder %v1488_v14, %v1653_v42  ;;  %v873_v36 = vsel %vm865_vm0, %v1365_v11, 8.0  ;;  %v874_v25 = vsel %vm866_vm1, %v1365_v11, 8.0  ;;  %vm870_vm5 = vcmp.eq.f32.partialorder %v1492_v40, %v1668_v57 }
  0x82   :  { %v794_v0 = vmul.f32 0.5, %v793_v45  ;;  %v795_v27 = vsub.f32 %v1670_v24, %v792_v23  ;;  %v857_v28 = vrot.slane %v856_v54, 1  ;;  %v862_v41 = vmin.f32 %v860_v22, %v861_v55 }
  0x83   :  { %v875_v14 = vsel %vm867_vm2, %v1365_v11, 8.0  ;;  %v876_v32 = vsel %vm868_vm3, %v1365_v11, 8.0  ;;  %v877_v21 = vsel %vm869_vm4, %v1365_v11, 8.0  ;;  %v878_v3 = vsel %vm870_vm5, %v1365_v11, 8.0 }
  0x84   :  { %v796_v31 = vmul.f32 0.5, %v795_v27  ;;  %v797_v10 = vmul.f32 %v794_v0, %v794_v0  ;;  %v1691_v48 = vmin.f32 %v856_v54, %v857_v28  ;;  %v863_v40 = vrot.slane %v862_v41, 1 }
  0x85   :  { %v881_v29 = vrot.slane %v873_v36, 4  ;;  %v887_v9 = vrot.slane %v874_v25, 4  ;;  %v893_v33 = vrot.slane %v875_v14, 4  ;;  %v899_v39 = vrot.slane %v876_v32, 4 }
  0x86   :  { %v798_v35 = vmul.f32 %v796_v31, %v796_v31  ;;  %vm871_vm6 = vcmp.eq.f32.partialorder %v1500_v43, %v1691_v48  ;;  %v905_v37 = vrot.slane %v877_v21, 4  ;;  %v1696_v38 = vmin.f32 %v862_v41, %v863_v40 }
  0x87   :  { %v879_v44 = vsel %vm871_vm6, %v1365_v11, 8.0  ;;  %v882_v47 = vmin.f32 %v873_v36, %v881_v29  ;;  %v888_v49 = vmin.f32 %v874_v25, %v887_v9  ;;  %v894_v18 = vmin.f32 %v875_v14, %v893_v33 }
  0x88   :  { %v1699_v50 = vadd.f32 %v798_v35, %v797_v10  ;;  %v900_v4 = vmin.f32 %v876_v32, %v899_v39  ;;  %v906_v5 = vmin.f32 %v877_v21, %v905_v37  ;;  %vm872_vm7 = vcmp.eq.f32.partialorder %v1510_v46, %v1696_v38 }
  0x89   :  { %v883_v51 = vrot.slane %v882_v47, 2  ;;  %v889_v26 = vrot.slane %v888_v49, 2  ;;  %v911_v8 = vrot.slane %v878_v3, 4  ;;  %v880_v43 = vsel %vm872_vm7, %v1365_v11, 8.0 }
  0x8a   :  { %v895_v58 = vrot.slane %v894_v18, 2  ;;  %v901_v60 = vrot.slane %v900_v4, 2  ;;  %v907_v2 = vrot.slane %v906_v5, 2  ;;  %v917_v7 = vrot.slane %v879_v44, 4 }
  0x8b   :  { %v884_v1 = vmin.f32 %v882_v47, %v883_v51  ;;  %v890_v56 = vmin.f32 %v888_v49, %v889_v26  ;;  %v912_v63 = vmin.f32 %v878_v3, %v911_v8  ;;  %v923_v15 = vrot.slane %v880_v43, 4 }
  0x8c   :  { %v896_v34 = vmin.f32 %v894_v18, %v895_v58  ;;  %v902_v16 = vmin.f32 %v900_v4, %v901_v60  ;;  %v908_v17 = vmin.f32 %v906_v5, %v907_v2  ;;  %v918_v46 = vmin.f32 %v879_v44, %v917_v7 }
  0x8d   :  { %v885_v19 = vrot.slane %v884_v1, 1  ;;  %v891_v12 = vrot.slane %v890_v56, 1  ;;  %v913_v30 = vrot.slane %v912_v63, 2  ;;  %v924_v45 = vmin.f32 %v880_v43, %v923_v15 }
  0x8e   :  { %v897_v23 = vrot.slane %v896_v34, 1  ;;  %v903_v54 = vrot.slane %v902_v16, 1  ;;  %v909_v55 = vrot.slane %v908_v17, 1  ;;  %v919_v25 = vrot.slane %v918_v46, 2 }
  0x8f   :  { %v886_v20 = vmin.f32 %v884_v1, %v885_v19  ;;  %v892_v22 = vmin.f32 %v890_v56, %v891_v12  ;;  %v914_v36 = vmin.f32 %v912_v63, %v913_v30  ;;  %v925_v27 = vrot.slane %v924_v45, 2 }
  0x90   :  { %v898_v0 = vmin.f32 %v896_v34, %v897_v23  ;;  %v904_v28 = vmin.f32 %v902_v16, %v903_v54  ;;  %v910_v41 = vmin.f32 %v908_v17, %v909_v55  ;;  %v920_v32 = vmin.f32 %v918_v46, %v919_v25 }
  0x91   :  { %vm929_vm8 = vcmp.eq.f32.partialorder %v1365_v11, %v886_v20  ;;  %vm930_vm9 = vcmp.eq.f32.partialorder %v1365_v11, %v892_v22  ;;  %v915_v14 = vrot.slane %v914_v36, 1  ;;  %v926_v21 = vmin.f32 %v924_v45, %v925_v27 }
  0x92   :  { %vm931_vm10 = vcmp.eq.f32.partialorder %v1365_v11, %v898_v0  ;;  %v1708_v31 = vsel %vm929_vm8, 1.0, %v1318_v59  ;;  %v1711_v10 = vsel %vm930_vm9, 1.0, %v1318_v59  ;;  %v921_v40 = vrot.slane %v920_v32, 1 }
  0x93   :  { %v916_v3 = vmin.f32 %v914_v36, %v915_v14  ;;  %vm932_vm11 = vcmp.eq.f32.partialorder %v1365_v11, %v904_v28  ;;  %vm933_vm12 = vcmp.eq.f32.partialorder %v1365_v11, %v910_v41  ;;  %v927_v29 = vrot.slane %v926_v21, 1 }
  0x94   :  { %v1218_v9 = vsel %vm931_vm10, 1.0, %v1318_v59  ;;  %v1219_v33 = vsel %vm932_vm11, 1.0, %v1318_v59  ;;  %v922_v35 = vmin.f32 %v920_v32, %v921_v40  ;;  %v1220_v39 = vsel %vm933_vm12, 1.0, %v1318_v59 }
  0x95   :  { %vm934_vm13 = vcmp.eq.f32.partialorder %v1365_v11, %v916_v3  ;;  %v928_v37 = vmin.f32 %v926_v21, %v927_v29  ;;  %v953_v47 = vmul.f32 %v1708_v31, %v1658_v53  ;;  %v954_v49 = vmul.f32 %v1711_v10, %v1658_v53 }
  0x96   :  { %v1221_v44 = vsel %vm934_vm13, 1.0, %v1318_v59  ;;  %vm935_vm14 = vcmp.eq.f32.partialorder %v1365_v11, %v922_v35  ;;  %v955_v18 = vmul.f32 %v1218_v9, %v1658_v53  ;;  %v956_v4 = vmul.f32 %v1219_v33, %v1658_v53 }
  0x97   :  { %v1222_v5 = vsel %vm935_vm14, 1.0, %v1318_v59  ;;  %v957_v51 = vmul.f32 %v1220_v39, %v1658_v53  ;;  %v958_v26 = vmul.f32 %v1221_v44, %v1658_v53  ;;  %vm936_vm15 = vcmp.eq.f32.partialorder %v1365_v11, %v928_v37 }
  0x98   :  { %v959_v8 = vmul.f32 %v1222_v5, %v1658_v53  ;;  %v961_v43 = vrot.slane %v953_v47, 4  ;;  %v967_v1 = vrot.slane %v954_v49, 4  ;;  %v973_v56 = vrot.slane %v955_v18, 4 }
  0x99   :  { %v979_v58 = vrot.slane %v956_v4, 4  ;;  %v985_v60 = vrot.slane %v957_v51, 4  ;;  %v991_v2 = vrot.slane %v958_v26, 4  ;;  %v1733_v34 = vsel %vm936_vm15, 1.0, %v1318_v59 }
  0x9a   :  { %v962_v63 = vadd.f32 %v961_v43, %v953_v47  ;;  %v968_v7 = vadd.f32 %v967_v1, %v954_v49  ;;  %v974_v19 = vadd.f32 %v973_v56, %v955_v18  ;;  %v997_v12 = vrot.slane %v959_v8, 4 }
  0x9b   :  { %v980_v15 = vadd.f32 %v979_v58, %v956_v4  ;;  %v986_v16 = vadd.f32 %v985_v60, %v957_v51  ;;  %v992_v17 = vadd.f32 %v991_v2, %v958_v26  ;;  %v960_v0 = vmul.f32 %v1733_v34, %v1658_v53 }
  0x9c   :  { %v963_v30 = vrot.slane %v962_v63, 2  ;;  %v969_v46 = vrot.slane %v968_v7, 2  ;;  %v975_v20 = vrot.slane %v974_v19, 2  ;;  %v998_v11 = vadd.f32 %v997_v12, %v959_v8 }
  0x9d   :  { %v981_v22 = vrot.slane %v980_v15, 2  ;;  %v987_v23 = vrot.slane %v986_v16, 2  ;;  %v993_v45 = vrot.slane %v992_v17, 2  ;;  %1234 = vrsqrt.f32 %v1699_v50 }
  0x9e   :  { %v964_v54 = vadd.f32 %v963_v30, %v962_v63  ;;  %v970_v55 = vadd.f32 %v969_v46, %v968_v7  ;;  %v976_v36 = vadd.f32 %v975_v20, %v974_v19  ;;  %v999_v25 = vrot.slane %v998_v11, 2 }
  0x9f   :  { %v982_v27 = vadd.f32 %v981_v22, %v980_v15  ;;  %v988_v59 = vadd.f32 %v987_v23, %v986_v16  ;;  %v994_v28 = vadd.f32 %v993_v45, %v992_v17  ;;  %v1003_v53 = vrot.slane %v960_v0, 4 }
  0xa0   :  { %v965_v41 = vrot.slane %v964_v54, 1  ;;  %v971_v14 = vrot.slane %v970_v55, 1  ;;  %v977_v32 = vrot.slane %v976_v36, 1  ;;  %v1000_v21 = vadd.f32 %v999_v25, %v998_v11 }
  0xa1   :  { %v983_v3 = vrot.slane %v982_v27, 1  ;;  %v989_v40 = vrot.slane %v988_v59, 1  ;;  %v995_v47 = vrot.slane %v994_v28, 1  ;;  %v1009_v18 = vmul.f32 %v1708_v31, %v1670_v24 }
  0xa2   :  { %v1738_v29 = vadd.f32 %v965_v41, %v964_v54  ;;  %v1740_v35 = vadd.f32 %v971_v14, %v970_v55  ;;  %v1742_v37 = vadd.f32 %v977_v32, %v976_v36  ;;  %v1001_v49 = vrot.slane %v1000_v21, 1 }
  0xa3   :  { %v1010_v4 = vmul.f32 %v1711_v10, %v1670_v24  ;;  %v1748_v51 = vadd.f32 %v983_v3, %v982_v27  ;;  %v1011_v26 = vmul.f32 %v1218_v9, %v1670_v24  ;;  %v1012_v8 = vmul.f32 %v1219_v33, %v1670_v24 }
  0xa4   :  { %v1013_v43 = vmul.f32 %v1220_v39, %v1670_v24  ;;  %v1753_v1 = vadd.f32 %v989_v40, %v988_v59  ;;  %v1004_v56 = vadd.f32 %v1003_v53, %v960_v0  ;;  %v1014_v58 = vmul.f32 %v1221_v44, %v1670_v24 }
  0xa5   :  { %v1015_v60 = vmul.f32 %v1222_v5, %v1670_v24  ;;  %v1017_v2 = vrot.slane %v1009_v18, 4  ;;  %v1023_v31 = vrot.slane %v1010_v4, 4  ;;  %v1029_v63 = vrot.slane %v1011_v26, 4 }
  0xa6   :  { %v1035_v7 = vrot.slane %v1012_v8, 4  ;;  %v1005_v10 = vrot.slane %v1004_v56, 2  ;;  %v1041_v19 = vrot.slane %v1013_v43, 4  ;;  %v1047_v12 = vrot.slane %v1014_v58, 4 }
  0xa7   :  { %v1053_v15 = vrot.slane %v1015_v60, 4  ;;  %v1018_v9 = vadd.f32 %v1017_v2, %v1009_v18  ;;  %v1024_v16 = vadd.f32 %v1023_v31, %v1010_v4  ;;  %v1030_v33 = vadd.f32 %v1029_v63, %v1011_v26  ;;  %v1757_v23 = vpop.eup %1234 }
  0xa8   :  { %v1036_v17 = vadd.f32 %v1035_v7, %v1012_v8  ;;  %v1006_v39 = vadd.f32 %v1005_v10, %v1004_v56  ;;  %v1042_v30 = vadd.f32 %v1041_v19, %v1013_v43  ;;  %v1048_v46 = vadd.f32 %v1047_v12, %v1014_v58 }
  0xa9   :  { %v1054_v20 = vadd.f32 %v1053_v15, %v1015_v60  ;;  %v1019_v11 = vrot.slane %v1018_v9, 2  ;;  %v1025_v44 = vrot.slane %v1024_v16, 2  ;;  %v1031_v22 = vrot.slane %v1030_v33, 2 }
  0xaa   :  { %v1037_v5 = vrot.slane %v1036_v17, 2  ;;  %v1016_v45 = vmul.f32 %v1733_v34, %v1670_v24  ;;  %v1043_v54 = vrot.slane %v1042_v30, 2  ;;  %v1049_v55 = vrot.slane %v1048_v46, 2 }
  0xab   :  { %v1055_v36 = vrot.slane %v1054_v20, 2  ;;  %v1020_v25 = vadd.f32 %v1019_v11, %v1018_v9  ;;  %v1026_v0 = vadd.f32 %v1025_v44, %v1024_v16  ;;  %v1032_v27 = vadd.f32 %v1031_v22, %v1030_v33  ;;  %v1238_v11 = vld [vmem:[#allocation2] sm:$0xff] }
  0xac   :  { %v1038_v59 = vadd.f32 %v1037_v5, %v1036_v17  ;;  %v1007_v41 = vrot.slane %v1006_v39, 1  ;;  %v1044_v14 = vadd.f32 %v1043_v54, %v1042_v30  ;;  %v1050_v32 = vadd.f32 %v1049_v55, %v1048_v46  ;;  %v1239_v5 = vld [vmem:[#allocation2 + $0x8] sm:$0xff] }
  0xad   :  { %v1056_v3 = vadd.f32 %v1055_v36, %v1054_v20  ;;  %v1021_v40 = vrot.slane %v1020_v25, 1  ;;  %v1027_v53 = vrot.slane %v1026_v0, 1  ;;  %v1033_v18 = vrot.slane %v1032_v27, 1 }
  0xae   :  { %v1039_v4 = vrot.slane %v1038_v59, 1  ;;  %v996_v26 = vadd.f32 %v995_v47, %v994_v28  ;;  %v1045_v8 = vrot.slane %v1044_v14, 1  ;;  %v1051_v43 = vrot.slane %v1050_v32, 1 }
  0xaf   :  { %v1059_v56 = vrot.slane %v1016_v45, 4  ;;  %v1002_v24 = vadd.f32 %v1001_v49, %v1000_v21  ;;  %v1022_v34 = vadd.f32 %v1021_v40, %v1020_v25  ;;  %v1028_v58 = vadd.f32 %v1027_v53, %v1026_v0 }
  0xb0   :  { %v1057_v60 = vrot.slane %v1056_v3, 1  ;;  %v1008_v2 = vadd.f32 %v1007_v41, %v1006_v39  ;;  %v1034_v31 = vadd.f32 %v1033_v18, %v1032_v27  ;;  %v1040_v63 = vadd.f32 %v1039_v4, %v1038_v59 }
  0xb1   :  { %v1060_v7 = vadd.f32 %v1059_v56, %v1016_v45  ;;  %v1046_v10 = vadd.f32 %v1045_v8, %v1044_v14  ;;  %vm1073_vm0 = vcmask 1041409   ;;  %vm1075_vm1 = vcmask 1042434  }
  0xb2   :  { %vm1077_vm2 = vcmask 1043459   ;;  %v1052_v19 = vadd.f32 %v1051_v43, %v1050_v32  ;;  %v1074_v28 = vsel %vm1073_vm0, %v1740_v35, %v1738_v29  ;;  %vm1079_vm3 = vcmask 1044484  }
  0xb3   :  { %v1061_v12 = vrot.slane %v1060_v7, 2  ;;  %v1058_v47 = vadd.f32 %v1057_v60, %v1056_v3  ;;  %v1076_v21 = vsel %vm1075_vm1, %v1742_v37, %v1074_v28  ;;  %vm1081_vm4 = vcmask 1045509  }
  0xb4   :  { %v1098_v49 = vsel %vm1073_vm0, %v1028_v58, %v1022_v34  ;;  %v1078_v9 = vsel %vm1077_vm2, %v1748_v51, %v1076_v21  ;;  %vm1083_vm5 = vcmask 1046534   ;;  %vm1833_vm6 = vcmask 1047559  }
  0xb5   :  { %v1062_v15 = vadd.f32 %v1061_v12, %v1060_v7  ;;  %v1099_v16 = vsel %vm1075_vm1, %v1034_v31, %v1098_v49  ;;  %v1080_v33 = vsel %vm1079_vm3, %v1753_v1, %v1078_v9  ;;  %v801_v36 = vmul.f32 %v1757_v23, %v1699_v50 }
  0xb6   :  { %v1100_v29 = vsel %vm1077_vm2, %v1040_v63, %v1099_v16  ;;  %v1082_v17 = vsel %vm1081_vm4, %v996_v26, %v1080_v33  ;;  %vm802_vm7 = vcmp.eq.f32.partialorder %v1699_v50, inf  ;;  %v805_v0 = vand.u32 2147483648, %v1699_v50 }
  0xb7   :  { %v1063_v35 = vrot.slane %v1062_v15, 1  ;;  %v1101_v37 = vsel %vm1079_vm3, %v1046_v10, %v1100_v29  ;;  %v1084_v39 = vsel %vm1083_vm5, %v1002_v24, %v1082_v17  ;;  %v803_v59 = vsel %vm802_vm7, %v1699_v50, %v801_v36 }
  0xb8   :  { %v1102_v30 = vsel %vm1081_vm4, %v1052_v19, %v1101_v37  ;;  %v1086_v51 = vsel %vm1833_vm6, %v1008_v2, %v1084_v39  ;;  %vm804_vm8 = vcmp.eq.f32.partialorder %v1699_v50, 0.0  ;;  %vm807_vm9 = vcmp.gt.f32.partialorder %v1562_v61, 6.0 }
  0xb9   :  { %v1064_v46 = vadd.f32 %v1063_v35, %v1062_v15  ;;  %v1103_v20 = vsel %vm1083_vm5, %v1058_v47, %v1102_v30  ;;  %v1088_v44 = vsub.f32 %v1238_v11, %v1086_v51  ;;  %v806_v41 = vsel %vm804_vm8, %v805_v0, %v803_v59 }
  0xba   :  { %v808_v14 = vsel %vm807_vm9, 1.0, %v806_v41  ;;  %vm1118_vm12 = vcmp.gt.f32.partialorder %v1642_v6, 6.0  ;;  %vm1119_vm13 = vcmp.gt.f32.partialorder %v1646_v62, 6.0  ;;  %vm1120_vm14 = vcmp.gt.f32.partialorder %v1648_v52, 6.0 }
  0xbb   :  { %v1104_v1 = vsel %vm1833_vm6, %v1064_v46, %v1103_v20  ;;  %v1089_v22 = vmul.f32 0.5, %v1088_v44  ;;  %v809_v32 = vrot.slane %v808_v14, 4  ;;  %vm1121_vm15 = vcmp.gt.f32.partialorder %v1651_v13, 6.0 }
  0xbc   :  { %v1106_v45 = vsub.f32 %v1239_v5, %v1104_v1  ;;  %vm1122_vm7 = vcmp.gt.f32.partialorder %v1653_v42, 6.0  ;;  %vm1123_vm8 = vcmp.gt.f32.partialorder %v1668_v57, 6.0  ;;  %vm1124_vm9 = vcmp.gt.f32.partialorder %v1691_v48, 6.0 }
  0xbd   :  { %v1108_v55 = vmul.f32 %v1089_v22, %v1089_v22  ;;  %v810_v53 = vadd.f32 %v809_v32, %v808_v14  ;;  %vm1125_vm6 = vcmp.gt.f32.partialorder %v1696_v38, 6.0 }
  0xbe   :  { %v1107_v54 = vmul.f32 0.5, %v1106_v45 }
  0xbf   :  { %v811_v63 = vrot.slane %v810_v53, 2 }
  0xc0   :  { %v1109_v25 = vmul.f32 %v1107_v54, %v1107_v54 }
  0xc1   :  { %v812_v49 = vadd.f32 %v811_v63, %v810_v53 }
  0xc2   :  { %v1110_v27 = vadd.f32 %v1109_v25, %v1108_v55 }
  0xc3   :  { %v813_v16 = vrot.slane %v812_v49, 1 }
  0xc4   :  { %1236 = vrsqrt.f32 %v1110_v27  ;;  %vm1113_vm10 = vcmp.eq.f32.partialorder %v1110_v27, inf  ;;  %v1116_v40 = vand.u32 2147483648, %v1110_v27  ;;  %vm1115_vm11 = vcmp.eq.f32.partialorder %v1110_v27, 0.0 }
  0xc5   :  { %v814_v35 = vadd.f32 %v813_v16, %v812_v49 }
  0xc7   :  { %v815_v39 = vsub.f32 0.0, %v814_v35 }
  0xc9   :  { %v816_v51 = vmul.f32 0.125, %v815_v39 }
  0xce   :  { %v1237_v3 = vpop.eup %1236 }
  0xcf   :  { %v1112_v23 = vmul.f32 %v1237_v3, %v1110_v27 }
  0xd1   :  { %v1114_v18 = vsel %vm1113_vm10, %v1110_v27, %v1112_v23 }
  0xd2   :  { %v1117_v61 = vsel %vm1115_vm11, %v1116_v40, %v1114_v18 }
  0xd3   :  { %v1127_v50 = vrot.slane %v1117_v61, 1  ;;  %v1128_v4 = vrot.slane %v1117_v61, 2  ;;  %v1129_v26 = vrot.slane %v1117_v61, 3  ;;  %v1130_v8 = vrot.slane %v1117_v61, 4 }
  0xd4   :  { %v1131_v43 = vrot.slane %v1117_v61, 5  ;;  %v1132_v56 = vrot.slane %v1117_v61, 6  ;;  %v1133_v24 = vrot.slane %v1117_v61, 7  ;;  %v1142_v34 = vsel %vm1118_vm12, 1.0, %v1117_v61 }
  0xd5   :  { %v1143_v58 = vsel %vm1119_vm13, 1.0, %v1127_v50  ;;  %v1144_v60 = vsel %vm1120_vm14, 1.0, %v1128_v4  ;;  %v1145_v2 = vsel %vm1121_vm15, 1.0, %v1129_v26  ;;  %v1146_v31 = vsel %vm1122_vm7, 1.0, %v1130_v8 }
  0xd6   :  { %v1147_v7 = vsel %vm1123_vm8, 1.0, %v1131_v43  ;;  %v1148_v6 = vsel %vm1124_vm9, 1.0, %v1132_v56  ;;  %v1158_v10 = vrot.slane %v1143_v58, 7  ;;  %v1149_v62 = vsel %vm1125_vm6, 1.0, %v1133_v24 }
  0xd7   :  { %v1160_v19 = vrot.slane %v1144_v60, 6  ;;  %v1162_v52 = vrot.slane %v1145_v2, 5  ;;  %v1164_v12 = vrot.slane %v1146_v31, 4  ;;  %v1166_v28 = vrot.slane %v1147_v7, 3 }
  0xd8   :  { %v1159_v13 = vsel %vm1073_vm0, %v1158_v10, %v1142_v34  ;;  %v1168_v47 = vrot.slane %v1148_v6, 2  ;;  %v1170_v57 = vrot.slane %v1149_v62, 1  ;;  %vm1834_vm6 = vcmask 1047559  }
  0xd9   :  { %v1161_v42 = vsel %vm1075_vm1, %v1160_v19, %v1159_v13 }
  0xda   :  { %v1163_v21 = vsel %vm1077_vm2, %v1162_v52, %v1161_v42 }
  0xdb   :  { %v1165_v48 = vsel %vm1079_vm3, %v1164_v12, %v1163_v21 }
  0xdc   :  { %v1167_v15 = vsel %vm1081_vm4, %v1166_v28, %v1165_v48 }
  0xdd   :  { %v1169_v38 = vsel %vm1083_vm5, %v1168_v47, %v1167_v15 }
  0xde   :  { %v1171_v9 = vsel %vm1834_vm6, %v1170_v57, %v1169_v38 }
  0xdf   :  { %v1173_v33 = vrot.slane %v1171_v9, 4 }
  0xe1   :  { %v1174_v29 = vadd.f32 %v1173_v33, %v1171_v9 }
  0xe3   :  { %v1175_v17 = vrot.slane %v1174_v29, 2 }
  0xe5   :  { %v1176_v37 = vadd.f32 %v1175_v17, %v1174_v29 }
  0xe7   :  { %v1177_v30 = vrot.slane %v1176_v37, 1 }
  0xe9   :  { %v1178_v46 = vadd.f32 %v1177_v30, %v1176_v37 }
  0xeb   :  { %v1179_v20 = vsub.f32 0.0, %v1178_v46 }
  0xed   :  { %v1180_v11 = vmul.f32 0.125, %v1179_v20 }
  0xef   :  { %v1181_v44 = vadd.f32 %v1180_v11, %v816_v51 }
  0xf1   :  { %v1182_v1 = vmul.f32 0.5, %v1181_v44 }
  0xf3   :  { %1183 = vst [vmem:[#allocation7] sm:$0x1] %v1182_v1 }
  0xf4   :  { %1295 = shalt.err (!%p1292_p6)
}
  0xf5   :  { %s1296_s11 = scalar_lea.hbm %s1832_s2, 16 }
  0xf6   :  { %p1297_p7 = scmp.ne.s32.totalorder %s1832_s2, %s1296_s11  ;;  %p1300_p8 = scmp.lt.u32.totalorder %s1296_s11, %s1832_s2 }
  0xf8   :  { %p1302_p9 = pnand %p1300_p8, %p1297_p7 }
  0xfa   :  { %1305 = shalt.err (!%p1302_p9)
}
  0xfb   :  { %1193 = dma.vmem_to_hbm [thread:$0]  %s1191_s6, 16, %s1832_s2, [#allocation4]  }
  0xfc   :  { %1310 = dma.done.wait [#allocation4], 16  }
  0xfd   :  { %1311 = vsyncadd [#allocation4], 4294967280 }
  0xfe   :  { %1197 = vsyncpa [#allocation3], 1 }
  0xff   :  { %1198 = vsyncpa [#allocation6], 1 }
 0x100   :  { %1199 = vsyncpa [#allocation4], 1 }

</bundles_post_ra>
